<compile_context>
chip_gen: v7x
topology: tpu7x:2x2x1
jax: 0.10.0
libtpu: 0.0.40
codegen_flags: <defaults>
</compile_context>

<pallas_src>
import jax
import jax.numpy as jnp
from jax.experimental import pallas as pl
from jax.experimental.pallas import tpu as pltpu

F = 784        # MNIST flattened features
C_PAD = 128    # lane-dense padded class dimension
TB_MAX = 1024  # batch tile: fits double-buffered in 16 MiB scoped VMEM (v5e)


def _logits_kernel(x_ref, wt_ref, o_ref):
    # One grid step: [TB, F] @ [F, 128] on the MXU, f32 accumulation.
    o_ref[...] = jnp.dot(
        x_ref[...], wt_ref[...], preferred_element_type=jnp.float32
    ).astype(o_ref.dtype)


def logistic_regression_forward(x, w, is_multi):
    """x: [B, 784] f32.  w: [10, 784] if is_multi else [784].  Returns logits
    ([B, 10] or [B, 1]) identical to the PyTorch forward."""
    B = x.shape[0]

    # --- plain-JAX glue: transpose / reshape weight, pad to lane-dense 128 ---
    if is_multi:
        wt = jnp.transpose(w)             # [784, 10]
    else:
        wt = jnp.reshape(w, (F, 1))       # [784, 1]
    C = wt.shape[1]
    wt_p = jnp.zeros((F, C_PAD), jnp.float32).at[:, :C].set(wt)

    # --- pad batch so the tile divides it exactly (sublane-aligned) ---------
    b8 = ((B + 7) // 8) * 8
    TB = min(TB_MAX, b8)
    Bp = ((b8 + TB - 1) // TB) * TB
    x_p = x if Bp == B else jnp.zeros((Bp, F), x.dtype).at[:B].set(x)

    grid = (Bp // TB,)

    out_p = pl.pallas_call(
        _logits_kernel,
        out_shape=jax.ShapeDtypeStruct((Bp, C_PAD), jnp.float32),
        grid_spec=pltpu.PrefetchScalarGridSpec(
            num_scalar_prefetch=0,
            grid=grid,
            in_specs=[
                pl.BlockSpec((TB, F), lambda i: (i, 0)),      # x tile, pipelined
                pl.BlockSpec((F, C_PAD), lambda i: (0, 0)),   # weight, resident
            ],
            out_specs=pl.BlockSpec((TB, C_PAD), lambda i: (i, 0)),
        ),
        compiler_params=pltpu.CompilerParams(
            dimension_semantics=("parallel",),                # megacore on v7x
        ),
        cost_estimate=pl.CostEstimate(
            flops=2 * Bp * F * C_PAD,
            transcendentals=0,
            bytes_accessed=Bp * F * 4 + F * C_PAD * 4 + Bp * C_PAD * 4,
        ),
    )(x_p, wt_p)

    # Slice the padded batch / padded classes back to the module's shape.
    return out_p[:B, :C]


if __name__ == "__main__":
    key = jax.random.PRNGKey(0)
    kx, kw_multi, kw_single = jax.random.split(key, 3)

    B = 8
    x = jax.random.normal(kx, (B, F), dtype=jnp.float32)

    # The module inits w to zeros; use small random values of the same shapes
    # so the kernel output is non-trivial.
    w_multi = 0.01 * jax.random.normal(kw_multi, (10, F), dtype=jnp.float32)
    w_single = 0.01 * jax.random.normal(kw_single, (F,), dtype=jnp.float32)

    # Multi-class branch: logits = x @ w.T  -> [B, 10]
    logits_multi = jax.block_until_ready(
        logistic_regression_forward(x, w_multi, is_multi=True)
    )
    ref_multi = x @ w_multi.T
    assert logits_multi.shape == (B, 10)
    assert jnp.allclose(logits_multi, ref_multi, atol=1e-4, rtol=1e-4)

    # Binary branch: logits = x @ w.reshape(-1, 1) -> [B, 1]
    logits_single = jax.block_until_ready(
        logistic_regression_forward(x, w_single, is_multi=False)
    )
    ref_single = x @ w_single.reshape(F, 1)
    assert logits_single.shape == (B, 1)
    assert jnp.allclose(logits_single, ref_single, atol=1e-4, rtol=1e-4)

    # Larger batch to exercise the tiled/pipelined path (multiple grid steps).
    kx2 = jax.random.PRNGKey(1)
    B2 = 2304  # not a multiple of TB -> exercises batch padding
    x2 = jax.random.normal(kx2, (B2, F), dtype=jnp.float32)
    logits2 = jax.block_until_ready(
        logistic_regression_forward(x2, w_multi, is_multi=True)
    )
    assert logits2.shape == (B2, 10)
    assert jnp.allclose(logits2, x2 @ w_multi.T, atol=1e-3, rtol=1e-3)

    print("KERNEL_OK")
</pallas_src>

<mosaic_0001>
module attributes {stable_mosaic.version = 11 : i64} {
  func.func @_logits_kernel(%arg0: i32, %arg1: memref<8x784xf32, #tpu.memory_space<vmem>>, %arg2: memref<784x128xf32, #tpu.memory_space<vmem>>, %arg3: memref<8x128xf32, #tpu.memory_space<vmem>>) attributes {dimension_semantics = [#tpu.dimension_semantics<parallel>], iteration_bounds = array<i64: 1>, scalar_prefetch = 0 : i64, scratch_operands = 0 : i64, tpu.core_type = #tpu.core_type<tc>, window_params = [{transform_indices = @transform_0, window_bounds = array<i64: 8, 784>}, {pipeline_mode = #tpu.pipeline_mode<synchronous>, transform_indices = @transform_1, window_bounds = array<i64: 784, 128>}, {transform_indices = @transform_2, window_bounds = array<i64: 8, 128>}]} {
    %c0 = arith.constant 0 : index
    %c0_0 = arith.constant 0 : index
    %0 = vector.load %arg1[%c0, %c0_0] : memref<8x784xf32, #tpu.memory_space<vmem>>, vector<8x784xf32>
    %c0_1 = arith.constant 0 : index
    %c0_2 = arith.constant 0 : index
    %1 = vector.load %arg2[%c0_1, %c0_2] : memref<784x128xf32, #tpu.memory_space<vmem>>, vector<784x128xf32>
    %cst = arith.constant dense<0.000000e+00> : vector<8x128xf32>
    %2 = tpu.matmul %0, %1, %cst {dimension_numbers = #tpu.dot_dimension_numbers<[1], [0], [0], [1], [0, 0, 1, 1], [], []>} : vector<8x784xf32>, vector<784x128xf32>, vector<8x128xf32> -> vector<8x128xf32>
    %c0_3 = arith.constant 0 : index
    %c0_4 = arith.constant 0 : index
    %3 = vector.load %arg3[%c0_3, %c0_4] : memref<8x128xf32, #tpu.memory_space<vmem>>, vector<8x128xf32>
    tpu.vector_store %arg3[%c0_3, %c0_4], %2 {strides = array<i32>} : memref<8x128xf32, #tpu.memory_space<vmem>>, vector<8x128xf32>,
    return
  }
  func.func @transform_0(%arg0: i32) -> (i32, i32) {
    %c0_i32 = arith.constant 0 : i32
    %c0_i32_0 = arith.constant 0 : i32
    return %arg0, %c0_i32 : i32, i32
  }
  func.func @transform_1(%arg0: i32) -> (i32, i32) {
    %c0_i32 = arith.constant 0 : i32
    %c0_i32_0 = arith.constant 0 : i32
    %c0_i32_1 = arith.constant 0 : i32
    return %c0_i32, %c0_i32_0 : i32, i32
  }
  func.func @transform_2(%arg0: i32) -> (i32, i32) {
    %c0_i32 = arith.constant 0 : i32
    %c0_i32_0 = arith.constant 0 : i32
    return %arg0, %c0_i32 : i32, i32
  }
}

</mosaic_0001>

<bundles_post_ra>
// kernel: tpu_custom_call.1
= control target key start
LH: loop header
LB: loop body
LE: loop exit
PB: predicated region body
PF: predicated region fallthrough
CT: control target
= control target key end

     0   :  { %7 = vsyncpa [#allocation3], 0  ;;  %s805_s0 = inlined_call_operand.hbm [shape: f32[8,784], index: 0, kind: input, shape index: {}]   ;;  %s806_s1 = inlined_call_operand.hbm [shape: f32[784,128], index: 1, kind: input, shape index: {}]   ;;  %s807_s2 = inlined_call_operand.hbm [shape: f32[8,128], index: 2, kind: output, shape index: {}]  }
   0x1   :  { %8 = vsyncpa [#allocation6], 0 }
   0x2   :  { %9 = vsyncpa [#allocation4], 0  ;;  %s739_s9 = smov [#allocation2]   ;;  %s740_s11 = smov [#allocation5]  }
   0x3   :  { %s16_s10 = sshll.u32 %s739_s9, 4  ;;  %s25_s12 = sshll.u32 %s740_s11, 4  ;;  %s17_s10 = int_to_ptr.vmem [resolvable:$true] %s16_s10  ;;  %s762_s12 = int_to_ptr.vmem [resolvable:$true] %s25_s12 }
   0x4   :  { %s667_s15 = scalar_lea.hbm %s805_s0, 896 }
   0x5   :  { %p668_p0 = scmp.ne.s32.totalorder %s805_s0, %s667_s15  ;;  %p671_p1 = scmp.lt.u32.totalorder %s667_s15, %s805_s0 }
   0x7   :  { %p673_p2 = pnand %p671_p1, %p668_p0 }
   0x9   :  { %676 = shalt.err (!%p673_p2)
}
   0xa   :  { %s677_s20 = scalar_lea.vmem %s17_s10, 896  ;;  %p682_p4 = scmp.lt.s32.totalorder %s17_s10, %s17_s10 }
   0xb   :  { %p678_p3 = scmp.ne.s32.totalorder %s17_s10, %s677_s20  ;;  %p683_p5 = scmp.lt.s32.totalorder %s677_s20, %s677_s20 }
   0xd   :  { %p684_p6 = por %p683_p5, %p682_p4 }
   0xf   :  { %p685_p7 = pnand %p684_p6, %p678_p3 }
  0x11   :  { %688 = shalt.err (!%p685_p7)
}
  0x12   :  { %19 = dma.hbm_to_vmem [thread:$0]  %s805_s0, 896, %s17_s10, [#allocation3]  }
  0x13   :  { %s689_s25 = scalar_lea.hbm %s806_s1, 12544 }
  0x14   :  { %p690_p8 = scmp.ne.s32.totalorder %s806_s1, %s689_s25  ;;  %p693_p9 = scmp.lt.u32.totalorder %s689_s25, %s806_s1 }
  0x16   :  { %p695_p10 = pnand %p693_p9, %p690_p8 }
  0x18   :  { %698 = shalt.err (!%p695_p10)
}
  0x19   :  { %s699_s30 = scalar_lea.vmem %s762_s12, 12544  ;;  %p704_p12 = scmp.lt.s32.totalorder %s762_s12, %s762_s12 }
  0x1a   :  { %p700_p11 = scmp.ne.s32.totalorder %s762_s12, %s699_s30  ;;  %p705_p13 = scmp.lt.s32.totalorder %s699_s30, %s699_s30 }
  0x1c   :  { %p706_p0 = por %p705_p13, %p704_p12 }
  0x1e   :  { %p707_p1 = pnand %p706_p0, %p700_p11 }
  0x20   :  { %710 = shalt.err (!%p707_p1)
}
  0x21   :  { %s741_s0 = smov 128   ;;  %s742_s3 = smov 8  }
  0x22   :  { %31 = dma.hbm_to_vmem [thread:$0]  %s806_s1, 12544, %s762_s12, [#allocation6], %s741_s0, %s741_s0, %s742_s3  }
  0x23   :  { %733 = dma.done.wait [#allocation3], 896  }
  0x24   :  { %734 = vsyncadd [#allocation3], 4294966400 }
  0x25   :  { %735 = dma.done.wait [#allocation6], 12544  }
  0x26   :  { %736 = vsyncadd [#allocation6], 4294954752  ;;  %v61_v0 = vld [vmem:[#allocation5 + $0x80] sm:$0xff]  ;;  %v62_v1 = vld [vmem:[#allocation5 + $0x88] sm:$0xff]  ;;  %vm744_vm0 = vmmov 0   ;;  %vm143_vm1 = vcmask 130048  }
  0x27   :  { %v93_v2 = vld [vmem:[#allocation5 + $0x180] sm:$0xff]  ;;  %v560_v3 = vpack.c.bf16 %v62_v1, %v61_v0  ;;  %v94_v4 = vld [vmem:[#allocation5 + $0x188] sm:$0xff]  ;;  %v63_v11 = vld [vmem:[#allocation5 + $0x90] sm:$0xff]  ;;  %s746_s1 = smov [#allocation7]  }
  0x28   :  { %v45_v5 = vld [vmem:[#allocation5] sm:$0xff]  ;;  %v46_v6 = vld [vmem:[#allocation5 + $0x8] sm:$0xff]  ;;  %v592_v7 = vpack.c.bf16 %v94_v4, %v93_v2  ;;  %v64_v13 = vld [vmem:[#allocation5 + $0x98] sm:$0xff]  ;;  %s434_s6 = sshll.u32 %s746_s1, 4  ;;  %s435_s6 = int_to_ptr.vmem [resolvable:$true] %s434_s6 }
  0x29   :  { %v562_v8 = vpack.c.bf16 %v46_v6, %v45_v5  ;;  %v77_v9 = vld [vmem:[#allocation5 + $0x100] sm:$0xff]  ;;  %v78_v10 = vld [vmem:[#allocation5 + $0x108] sm:$0xff]  ;;  %561 = vmatprep.subr.bf16.mxu0 %v560_v3  ;;  %v95_v14 = vld [vmem:[#allocation5 + $0x190] sm:$0xff]  ;;  %v564_v16 = vpack.c.bf16 %v64_v13, %v63_v11  ;;  %s711_s7 = scalar_lea.vmem %s435_s6, 128  ;;  %p716_p3 = scmp.lt.s32.totalorder %s435_s6, %s435_s6 }
  0x2a   :  { %v594_v12 = vpack.c.bf16 %v78_v10, %v77_v9  ;;  %v96_v15 = vld [vmem:[#allocation5 + $0x198] sm:$0xff]  ;;  %593 = vmatprep.subr.bf16.mxu1 %v592_v7  ;;  %v47_v18 = vld [vmem:[#allocation5 + $0x10] sm:$0xff]  ;;  %v65_v23 = vld [vmem:[#allocation5 + $0xa0] sm:$0xff]  ;;  %p712_p2 = scmp.ne.s32.totalorder %s435_s6, %s711_s7  ;;  %p717_p4 = scmp.lt.s32.totalorder %s711_s7, %s711_s7 }
  0x2b   :  { %563 = vmatpush3.bf16.msra.mxu0 %v562_v8  ;;  %v596_v17 = vpack.c.bf16 %v96_v15, %v95_v14  ;;  %v48_v19 = vld [vmem:[#allocation5 + $0x18] sm:$0xff]  ;;  %v79_v20 = vld [vmem:[#allocation5 + $0x110] sm:$0xff]  ;;  %v66_v24 = vld [vmem:[#allocation5 + $0xa8] sm:$0xff] }
  0x2c   :  { %595 = vmatpush3.bf16.msra.mxu1 %v594_v12  ;;  %v566_v21 = vpack.c.bf16 %v48_v19, %v47_v18  ;;  %v80_v22 = vld [vmem:[#allocation5 + $0x118] sm:$0xff]  ;;  %565 = vmatprep.subr.bf16.mxu0 %v564_v16  ;;  %v568_v26 = vpack.c.bf16 %v66_v24, %v65_v23  ;;  %v97_v27 = vld [vmem:[#allocation5 + $0x1a0] sm:$0xff]  ;;  %v98_v28 = vld [vmem:[#allocation5 + $0x1a8] sm:$0xff]  ;;  %p718_p5 = por %p717_p4, %p716_p3 }
  0x2d   :  { %597 = vmatprep.subr.bf16.mxu1 %v596_v17  ;;  %v598_v25 = vpack.c.bf16 %v80_v22, %v79_v20  ;;  %v49_v29 = vld [vmem:[#allocation5 + $0x20] sm:$0xff]  ;;  %v600_v30 = vpack.c.bf16 %v98_v28, %v97_v27  ;;  %v50_v31 = vld [vmem:[#allocation5 + $0x28] sm:$0xff]  ;;  %v67_v35 = vld [vmem:[#allocation5 + $0xb0] sm:$0xff] }
  0x2e   :  { %v81_v32 = vld [vmem:[#allocation5 + $0x120] sm:$0xff]  ;;  %v82_v33 = vld [vmem:[#allocation5 + $0x128] sm:$0xff]  ;;  %v570_v34 = vpack.c.bf16 %v50_v31, %v49_v29  ;;  %v68_v36 = vld [vmem:[#allocation5 + $0xb8] sm:$0xff]  ;;  %p719_p6 = pnand %p718_p5, %p712_p2 }
  0x2f   :  { %567 = vmatpush3.bf16.msra.mxu0 %v566_v21  ;;  %v99_v37 = vld [vmem:[#allocation5 + $0x1b0] sm:$0xff]  ;;  %v602_v38 = vpack.c.bf16 %v82_v33, %v81_v32  ;;  %v572_v39 = vpack.c.bf16 %v68_v36, %v67_v35  ;;  %v100_v40 = vld [vmem:[#allocation5 + $0x1b8] sm:$0xff]  ;;  %v69_v46 = vld [vmem:[#allocation5 + $0xc0] sm:$0xff] }
  0x30   :  { %599 = vmatpush3.bf16.msra.mxu1 %v598_v25  ;;  %569 = vmatprep.subr.bf16.mxu0 %v568_v26  ;;  %v51_v41 = vld [vmem:[#allocation5 + $0x30] sm:$0xff]  ;;  %v52_v42 = vld [vmem:[#allocation5 + $0x38] sm:$0xff]  ;;  %v604_v43 = vpack.c.bf16 %v100_v40, %v99_v37  ;;  %v70_v47 = vld [vmem:[#allocation5 + $0xc8] sm:$0xff] }
  0x31   :  { %601 = vmatprep.subr.bf16.mxu1 %v600_v30  ;;  %v83_v44 = vld [vmem:[#allocation5 + $0x130] sm:$0xff]  ;;  %v84_v45 = vld [vmem:[#allocation5 + $0x138] sm:$0xff]  ;;  %v101_v48 = vld [vmem:[#allocation5 + $0x1c0] sm:$0xff]  ;;  %v574_v50 = vpack.c.bf16 %v52_v42, %v51_v41  ;;  %v576_v52 = vpack.c.bf16 %v70_v47, %v69_v46 }
  0x32   :  { %v102_v49 = vld [vmem:[#allocation5 + $0x1c8] sm:$0xff]  ;;  %v606_v51 = vpack.c.bf16 %v84_v45, %v83_v44  ;;  %v53_v53 = vld [vmem:[#allocation5 + $0x40] sm:$0xff]  ;;  %v71_v58 = vld [vmem:[#allocation5 + $0xd0] sm:$0xff] }
  0x33   :  { %571 = vmatpush3.bf16.msra.mxu0 %v570_v34  ;;  %v54_v54 = vld [vmem:[#allocation5 + $0x48] sm:$0xff]  ;;  %v85_v55 = vld [vmem:[#allocation5 + $0x140] sm:$0xff]  ;;  %v608_v56 = vpack.c.bf16 %v102_v49, %v101_v48  ;;  %v72_v59 = vld [vmem:[#allocation5 + $0xd8] sm:$0xff] }
  0x34   :  { %603 = vmatpush3.bf16.msra.mxu1 %v602_v38  ;;  %573 = vmatprep.subr.bf16.mxu0 %v572_v39  ;;  %v86_v57 = vld [vmem:[#allocation5 + $0x148] sm:$0xff]  ;;  %v103_v60 = vld [vmem:[#allocation5 + $0x1d0] sm:$0xff]  ;;  %v104_v61 = vld [vmem:[#allocation5 + $0x1d8] sm:$0xff]  ;;  %v578_v62 = vpack.c.bf16 %v54_v54, %v53_v53  ;;  %v580_v0 = vpack.c.bf16 %v72_v59, %v71_v58 }
  0x35   :  { %605 = vmatprep.subr.bf16.mxu1 %v604_v43  ;;  %v610_v63 = vpack.c.bf16 %v86_v57, %v85_v55  ;;  %v55_v1 = vld [vmem:[#allocation5 + $0x50] sm:$0xff]  ;;  %v56_v2 = vld [vmem:[#allocation5 + $0x58] sm:$0xff]  ;;  %v612_v4 = vpack.c.bf16 %v104_v61, %v103_v60  ;;  %v73_v6 = vld [vmem:[#allocation5 + $0xe0] sm:$0xff]  ;;  %v745_v60 = vmov 0.0  }
  0x36   :  { %v87_v3 = vld [vmem:[#allocation5 + $0x150] sm:$0xff]  ;;  %v88_v5 = vld [vmem:[#allocation5 + $0x158] sm:$0xff]  ;;  %v74_v7 = vld [vmem:[#allocation5 + $0xe8] sm:$0xff]  ;;  %v582_v10 = vpack.c.bf16 %v56_v2, %v55_v1 }
  0x37   :  { %575 = vmatpush3.bf16.msra.mxu0 %v574_v50  ;;  %v105_v8 = vld [vmem:[#allocation5 + $0x1e0] sm:$0xff]  ;;  %v106_v9 = vld [vmem:[#allocation5 + $0x1e8] sm:$0xff]  ;;  %v614_v13 = vpack.c.bf16 %v88_v5, %v87_v3  ;;  %v584_v14 = vpack.c.bf16 %v74_v7, %v73_v6  ;;  %v39_v16 = vld [vmem:[#allocation2 + $0x8] sm:$0xff]  ;;  %v743_v50 = vmov 0.0|0.0  }
  0x38   :  { %607 = vmatpush3.bf16.msra.mxu1 %v606_v51  ;;  %577 = vmatprep.subr.bf16.mxu0 %v576_v52  ;;  %v57_v11 = vld [vmem:[#allocation5 + $0x60] sm:$0xff]  ;;  %v58_v12 = vld [vmem:[#allocation5 + $0x68] sm:$0xff]  ;;  %v616_v18 = vpack.c.bf16 %v106_v9, %v105_v8  ;;  %v75_v20 = vld [vmem:[#allocation5 + $0xf0] sm:$0xff] }
  0x39   :  { %609 = vmatprep.subr.bf16.mxu1 %v608_v56  ;;  %v89_v15 = vld [vmem:[#allocation5 + $0x160] sm:$0xff]  ;;  %v90_v19 = vld [vmem:[#allocation5 + $0x168] sm:$0xff]  ;;  %v76_v21 = vld [vmem:[#allocation5 + $0xf8] sm:$0xff]  ;;  %211 = vmatprep.mubr.f32.mxu0 %v39_v16  ;;  %v586_v24 = vpack.c.bf16 %v58_v12, %v57_v11 }
  0x3a   :  { %v41_v17 = vld [vmem:[#allocation2 + $0x18] sm:$0xff]  ;;  %v107_v22 = vld [vmem:[#allocation5 + $0x1f0] sm:$0xff]  ;;  %v108_v23 = vld [vmem:[#allocation5 + $0x1f8] sm:$0xff]  ;;  %v618_v25 = vpack.c.bf16 %v90_v19, %v89_v15  ;;  %v588_v26 = vpack.c.bf16 %v76_v21, %v75_v20 }
  0x3b   :  { %579 = vmatpush3.bf16.msra.mxu0 %v578_v62  ;;  %281 = vmatprep.mubr.f32.mxu1 %v41_v17  ;;  %v59_v27 = vld [vmem:[#allocation5 + $0x70] sm:$0xff]  ;;  %v60_v28 = vld [vmem:[#allocation5 + $0x78] sm:$0xff]  ;;  %v620_v30 = vpack.c.bf16 %v108_v23, %v107_v22  ;;  %v125_v32 = vld [vmem:[#allocation5 + $0x280] sm:$0xff] }
  0x3c   :  { %611 = vmatpush3.bf16.msra.mxu1 %v610_v63  ;;  %581 = vmatprep.subr.bf16.mxu0 %v580_v0  ;;  %v91_v29 = vld [vmem:[#allocation5 + $0x170] sm:$0xff]  ;;  %v92_v31 = vld [vmem:[#allocation5 + $0x178] sm:$0xff]  ;;  %v126_v33 = vld [vmem:[#allocation5 + $0x288] sm:$0xff]  ;;  %v590_v34 = vpack.c.bf16 %v60_v28, %v59_v27 }
  0x3d   :  { %613 = vmatprep.subr.bf16.mxu1 %v612_v4  ;;  %v622_v35 = vpack.c.bf16 %v92_v31, %v91_v29  ;;  %v624_v36 = vpack.c.bf16 %v126_v33, %v125_v32  ;;  %v109_v37 = vld [vmem:[#allocation5 + $0x200] sm:$0xff]  ;;  %v110_v38 = vld [vmem:[#allocation5 + $0x208] sm:$0xff]  ;;  %v127_v39 = vld [vmem:[#allocation5 + $0x290] sm:$0xff] }
  0x3e   :  { %v128_v40 = vld [vmem:[#allocation5 + $0x298] sm:$0xff]  ;;  %v38_v41 = vld [vmem:[#allocation2] sm:$0xff]  ;;  %v626_v43 = vpack.c.bf16 %v110_v38, %v109_v37  ;;  %v111_v44 = vld [vmem:[#allocation5 + $0x210] sm:$0xff] }
  0x3f   :  { %583 = vmatpush3.bf16.msra.mxu0 %v582_v10  ;;  %v40_v42 = vld [vmem:[#allocation2 + $0x10] sm:$0xff]  ;;  %v628_v45 = vpack.c.bf16 %v128_v40, %v127_v39  ;;  %v129_v47 = vld [vmem:[#allocation5 + $0x2a0] sm:$0xff]  ;;  %v130_v48 = vld [vmem:[#allocation5 + $0x2a8] sm:$0xff] }
  0x40   :  { %615 = vmatpush3.bf16.msra.mxu1 %v614_v13  ;;  %585 = vmatprep.subr.bf16.mxu0 %v584_v14  ;;  %v112_v46 = vld [vmem:[#allocation5 + $0x218] sm:$0xff]  ;;  %v43_v49 = vld [vmem:[#allocation2 + $0x28] sm:$0xff]  ;;  %v141_v51 = vld [vmem:[#allocation5 + $0x300] sm:$0xff]  ;;  %v632_v55 = vpack.c.bf16 %v130_v48, %v129_v47 }
  0x41   :  { %617 = vmatprep.subr.bf16.mxu1 %v616_v18  ;;  %v142_v52 = vld [vmem:[#allocation5 + $0x308] sm:$0xff]  ;;  %v630_v54 = vpack.c.bf16 %v112_v46, %v111_v44  ;;  %v113_v56 = vld [vmem:[#allocation5 + $0x220] sm:$0xff]  ;;  %v131_v58 = vld [vmem:[#allocation5 + $0x2b0] sm:$0xff] }
  0x42   :  { %v657_v53 = vpack.c.bf16 %v142_v52, %v141_v51  ;;  %v114_v57 = vld [vmem:[#allocation5 + $0x228] sm:$0xff]  ;;  %v132_v59 = vld [vmem:[#allocation5 + $0x2b8] sm:$0xff]  ;;  %v115_v0 = vld [vmem:[#allocation5 + $0x230] sm:$0xff] }
  0x43   :  { %587 = vmatpush3.bf16.msra.mxu0 %v586_v24  ;;  %v44_v61 = vld [vmem:[#allocation2 + $0x30] sm:$0xff]  ;;  %v634_v62 = vpack.c.bf16 %v114_v57, %v113_v56  ;;  %v636_v63 = vpack.c.bf16 %v132_v59, %v131_v58  ;;  %v133_v2 = vld [vmem:[#allocation5 + $0x2c0] sm:$0xff]  ;;  %v134_v3 = vld [vmem:[#allocation5 + $0x2c8] sm:$0xff] }
  0x44   :  { %619 = vmatpush3.bf16.msra.mxu1 %v618_v25  ;;  %589 = vmatprep.subr.bf16.mxu0 %v588_v26  ;;  %v116_v1 = vld [vmem:[#allocation5 + $0x238] sm:$0xff]  ;;  %v640_v5 = vpack.c.bf16 %v134_v3, %v133_v2  ;;  %v117_v6 = vld [vmem:[#allocation5 + $0x240] sm:$0xff]  ;;  %v118_v7 = vld [vmem:[#allocation5 + $0x248] sm:$0xff] }
  0x45   :  { %621 = vmatprep.subr.bf16.mxu1 %v620_v30  ;;  %v638_v4 = vpack.c.bf16 %v116_v1, %v115_v0  ;;  %v135_v8 = vld [vmem:[#allocation5 + $0x2d0] sm:$0xff]  ;;  %v136_v9 = vld [vmem:[#allocation5 + $0x2d8] sm:$0xff]  ;;  %v642_v10 = vpack.c.bf16 %v118_v7, %v117_v6  ;;  %v137_v14 = vld [vmem:[#allocation5 + $0x2e0] sm:$0xff] }
  0x46   :  { %v644_v11 = vpack.c.bf16 %v136_v9, %v135_v8  ;;  %v119_v12 = vld [vmem:[#allocation5 + $0x250] sm:$0xff]  ;;  %v120_v13 = vld [vmem:[#allocation5 + $0x258] sm:$0xff]  ;;  %v138_v15 = vld [vmem:[#allocation5 + $0x2e8] sm:$0xff] }
  0x47   :  { %591 = vmatpush3.bf16.msra.mxu0 %v590_v34  ;;  %v646_v16 = vpack.c.bf16 %v120_v13, %v119_v12  ;;  %v648_v17 = vpack.c.bf16 %v138_v15, %v137_v14  ;;  %v121_v18 = vld [vmem:[#allocation5 + $0x260] sm:$0xff]  ;;  %v122_v19 = vld [vmem:[#allocation5 + $0x268] sm:$0xff]  ;;  %v139_v20 = vld [vmem:[#allocation5 + $0x2f0] sm:$0xff] }
  0x48   :  { %623 = vmatpush3.bf16.msra.mxu1 %v622_v35  ;;  %625 = vmatprep.subr.bf16.mxu0 %v624_v36  ;;  %v140_v21 = vld [vmem:[#allocation5 + $0x2f8] sm:$0xff]  ;;  %v650_v22 = vpack.c.bf16 %v122_v19, %v121_v18  ;;  %v123_v24 = vld [vmem:[#allocation5 + $0x270] sm:$0xff]  ;;  %v42_v27 = vld [vmem:[#allocation2 + $0x20] sm:$0xff] }
  0x49   :  { %656 = vmatprep.subr.bf16.mxu1 %v743_v50  ;;  %v652_v23 = vpack.c.bf16 %v140_v21, %v139_v20  ;;  %v124_v25 = vld [vmem:[#allocation5 + $0x278] sm:$0xff] }
  0x4a   :  { %212 = vmatmul.mubr.f32.vlgmr.msra.gmra.mrb[0].mxu0 %v38_v41  ;;  %v654_v26 = vpack.c.bf16 %v124_v25, %v123_v24 }
  0x4b   :  { %282 = vmatmul.mubr.f32.vlgmr.msra.gmra.mrb[0].mxu1 %v40_v42  ;;  %627 = vmatpush3.bf16.msra.mxu0 %v626_v43 }
  0x4c   :  { %629 = vmatprep.subr.bf16.mxu0 %v628_v45  ;;  %351 = vmatprep.mubr.f32.mxu0 %v43_v49 }
  0x4d   :  { %658 = vmatpush3.bf16.msra.mxu1 %v657_v53  ;;  %557 = vmatprep.mubr.msk.f32.mxu1 %vm744_vm0, %v745_v60 }
  0x4f   :  { %631 = vmatpush3.bf16.msra.mxu0 %v630_v54 }
  0x50   :  { %633 = vmatprep.subr.bf16.mxu0 %v632_v55  ;;  %558 = vmatmul.mubr.msk.f32.vlgmr.msra.gmra.mrb[2].mxu1 %vm143_vm1, %v44_v61 }
  0x53   :  { %635 = vmatpush3.bf16.msra.mxu0 %v634_v62 }
  0x54   :  { %637 = vmatprep.subr.bf16.mxu0 %v636_v63 }
  0x57   :  { %639 = vmatpush3.bf16.msra.mxu0 %v638_v4 }
  0x58   :  { %641 = vmatprep.subr.bf16.mxu0 %v640_v5 }
  0x5b   :  { %643 = vmatpush3.bf16.msra.mxu0 %v642_v10 }
  0x5c   :  { %645 = vmatprep.subr.bf16.mxu0 %v644_v11 }
  0x5f   :  { %647 = vmatpush3.bf16.msra.mxu0 %v646_v16 }
  0x60   :  { %649 = vmatprep.subr.bf16.mxu0 %v648_v17 }
  0x63   :  { %651 = vmatpush3.bf16.msra.mxu0 %v650_v22 }
  0x64   :  { %653 = vmatprep.subr.bf16.mxu0 %v652_v23 }
  0x67   :  { %655 = vmatpush3.bf16.msra.mxu0 %v654_v26 }
  0x6a   :  { %352 = vmatmul.mubr.f32.vlgmr.msra.gmra.mrb[2].mxu0 %v42_v27 }
 0x11d   :  { %v477_v28 = vpop.f32.mrb[0].mxu0 }
 0x11e   :  { %v512_v29 = vpop.f32.mrb[0].mxu1  ;;  %v478_v30 = vpop.f32.mrb[1].mxu0 }
 0x11f   :  { %v479_v31 = vadd.f32 %v478_v30, %v477_v28  ;;  %v513_v32 = vpop.f32.mrb[1].mxu1 }
 0x120   :  { %v514_v33 = vadd.f32 %v513_v32, %v512_v29 }
 0x122   :  { %v284_v34 = vadd.f32 %v514_v33, %v479_v31 }
 0x123   :  { %v423_v35 = vpop.f32.mrb[2].mxu1 }
 0x124   :  { %v559_v36 = vpop.f32.mrb[3].mxu1 }
 0x13d   :  { %v547_v37 = vpop.f32.mrb[2].mxu0 }
 0x13e   :  { %v548_v38 = vpop.f32.mrb[3].mxu0 }
 0x13f   :  { %v549_v39 = vadd.f32 %v548_v38, %v547_v37 }
 0x141   :  { %v354_v40 = vadd.f32 %v549_v39, %v284_v34 }
 0x143   :  { %v424_v41 = vadd.f32 %v423_v35, %v354_v40 }
 0x145   :  { %427 = vst [vmem:[#allocation7] sm:$0xff] %v424_v41 }
 0x146   :  { %722 = shalt.err (!%p719_p6)
}
 0x147   :  { %s723_s10 = scalar_lea.hbm %s807_s2, 128 }
 0x148   :  { %p724_p7 = scmp.ne.s32.totalorder %s807_s2, %s723_s10  ;;  %p727_p8 = scmp.lt.u32.totalorder %s723_s10, %s807_s2 }
 0x14a   :  { %p729_p9 = pnand %p727_p8, %p724_p7 }
 0x14c   :  { %732 = shalt.err (!%p729_p9)
}
 0x14d   :  { %437 = dma.vmem_to_hbm [thread:$0]  %s435_s6, 128, %s807_s2, [#allocation4]  }
 0x14e   :  { %737 = dma.done.wait [#allocation4], 128  }
 0x14f   :  { %738 = vsyncadd [#allocation4], 4294967168 }
 0x150   :  { %441 = vsyncpa [#allocation3], 1 }
 0x151   :  { %442 = vsyncpa [#allocation6], 1 }
 0x152   :  { %443 = vsyncpa [#allocation4], 1 }

</bundles_post_ra>
